<compile_context>
chip_gen: v5e
topology: v5e:2x2
jax: 0.10.0
libtpu: 0.0.40
codegen_flags: <defaults>
</compile_context>

<pallas_src>
import functools

import jax
import jax.numpy as jnp
from jax.experimental import pallas as pl
from jax.experimental.pallas import tpu as pltpu


def _round_up(x, n):
    return ((x + n - 1) // n) * n


def lmcl_kernel(feat_ref, centers_ref, label_ref, logits_ref, margin_ref,
                ncent_ref, *, s, m, block_c):
    # Normalize the resident centers tile once per class tile (batch_id == 0)
    # and cache it in VMEM scratch; reused across the whole batch sweep.
    @pl.when(pl.program_id(1) == 0)
    def _():
        centers = centers_ref[...].astype(jnp.float32)               # [TC, D]
        inv_c = jax.lax.rsqrt(
            jnp.maximum(jnp.sum(centers * centers, axis=-1, keepdims=True),
                        jnp.float32(1e-12)))
        ncent_ref[...] = centers * inv_c

    # Normalize this batch tile of features (small: TB x D).
    feat = feat_ref[...].astype(jnp.float32)                          # [TB, D]
    inv_f = jax.lax.rsqrt(
        jnp.maximum(jnp.sum(feat * feat, axis=-1, keepdims=True),
                    jnp.float32(1e-12)))
    nfeat = feat * inv_f

    # Cosine logits: contract last dims of both operands -> MXU matmul with no
    # explicit transpose of the [TC, D] normalized-centers tile.  [TB, TC]
    logits = jax.lax.dot_general(
        nfeat, ncent_ref[...],
        dimension_numbers=(((1,), (1,)), ((), ())),
        preferred_element_type=jnp.float32)
    logits_ref[...] = logits

    # margin_logits = s * (logits - m * onehot(label)) = s*logits - (s*m)[label]
    label = label_ref[...]                                            # [TB, 1] int32
    j = pl.program_id(0)                                              # class tile
    cls_ids = j * block_c + jax.lax.broadcasted_iota(jnp.int32, logits.shape, 1)
    margin_ref[...] = jnp.float32(s) * logits - jnp.where(
        cls_ids == label, jnp.float32(s * m), jnp.float32(0.0))


def lmcl_loss_forward(feat, centers, label, *, s=7.0, m=0.2,
                      block_b=None, block_c=None):
    """Pallas TPU implementation of LMCL_loss.forward.

    feat:    [B, D] float32
    centers: [C, D] float32  (the nn.Parameter)
    label:   [B]    int32
    returns (logits [B, C], margin_logits [B, C])
    """
    B, D = feat.shape
    C, Dc = centers.shape
    assert D == Dc, "feat and centers must share the feature dim"

    # Pad batch to a sublane multiple and classes to a lane multiple so output
    # tiles are (8,128)-aligned and stores are lane-dense.
    B_pad = _round_up(B, 8)
    C_pad = _round_up(C, 128)

    if block_b is None:
        block_b = min(B_pad, 128)
    if block_c is None:
        # Keep the resident centers tile (plus its normalized scratch copy)
        # well inside VMEM: ~4 MiB of f32 per copy at most.
        max_c_by_vmem = max(128, ((1 << 22) // (4 * D)) // 128 * 128)
        block_c = min(C_pad, 1024, max_c_by_vmem)
    B_pad = _round_up(B_pad, block_b)
    C_pad = _round_up(C_pad, block_c)

    feat_p = jnp.pad(feat.astype(jnp.float32), ((0, B_pad - B), (0, 0)))
    centers_p = jnp.pad(centers.astype(jnp.float32), ((0, C_pad - C), (0, 0)))
    # Padded batch rows get label -1 (never matches any class id).
    label_p = jnp.pad(label.astype(jnp.int32), (0, B_pad - B),
                      constant_values=-1).reshape(B_pad, 1)

    kernel = functools.partial(lmcl_kernel, s=s, m=m, block_c=block_c)

    # Grid: class tiles OUTER (parallel, megacore-shardable), batch tiles INNER
    # (arbitrary -> sequential, so the centers tile + its normalized copy stay
    # resident and are normalized exactly once per class tile).
    grid = (C_pad // block_c, B_pad // block_b)
    out_shapes = (
        jax.ShapeDtypeStruct((B_pad, C_pad), jnp.float32),
        jax.ShapeDtypeStruct((B_pad, C_pad), jnp.float32),
    )

    logits_p, margin_p = pl.pallas_call(
        kernel,
        out_shape=out_shapes,
        grid=grid,
        in_specs=[
            pl.BlockSpec((block_b, D), lambda j, i: (i, 0)),   # feat: streamed over batch tiles
            pl.BlockSpec((block_c, D), lambda j, i: (j, 0)),   # centers: resident across batch tiles
            pl.BlockSpec((block_b, 1), lambda j, i: (i, 0)),   # label: streamed with feat
        ],
        out_specs=(
            pl.BlockSpec((block_b, block_c), lambda j, i: (i, j)),
            pl.BlockSpec((block_b, block_c), lambda j, i: (i, j)),
        ),
        scratch_shapes=[pltpu.VMEM((block_c, D), jnp.float32)],   # normalized centers cache
        compiler_params=pltpu.CompilerParams(
            dimension_semantics=("parallel", "arbitrary"),
            vmem_limit_bytes=32 * 1024 * 1024,   # safe on v5e/v6e/v7x; usage stays well below
        ),
    )(feat_p, centers_p, label_p)

    return logits_p[:B, :C], margin_p[:B, :C]


if __name__ == "__main__":
    # Small shapes consistent with the module: batch=8, feat_dim=32, num_classes=16
    B, D, C = 8, 32, 16
    s_param, m_param = 7.0, 0.2

    key = jax.random.PRNGKey(0)
    k_feat, k_centers, k_label = jax.random.split(key, 3)

    feat = jax.random.normal(k_feat, (B, D), dtype=jnp.float32)
    # Deterministic stand-in for the nn.Parameter centers ~ randn(num_classes, feat_dim)
    centers = jax.random.normal(k_centers, (C, D), dtype=jnp.float32)
    label = jax.random.randint(k_label, (B,), 0, C, dtype=jnp.int32)

    logits, margin_logits = lmcl_loss_forward(
        feat, centers, label, s=s_param, m=m_param
    )
    jax.block_until_ready((logits, margin_logits))

    # Reference check in plain JAX (f32 end to end).
    nfeat = feat / jnp.linalg.norm(feat, axis=-1, keepdims=True)
    ncent = centers / jnp.linalg.norm(centers, axis=-1, keepdims=True)
    ref_logits = nfeat @ ncent.T
    y_onehot = jax.nn.one_hot(label, C, dtype=jnp.float32) * m_param
    ref_margin = s_param * (ref_logits - y_onehot)

    assert logits.shape == (B, C) and margin_logits.shape == (B, C)
    assert jnp.allclose(logits, ref_logits, atol=1e-5, rtol=1e-5)
    assert jnp.allclose(margin_logits, ref_margin, atol=1e-5, rtol=1e-5)

    print("KERNEL_OK")
</pallas_src>

<mosaic_0001>
module attributes {stable_mosaic.version = 11 : i64} {
  func.func @lmcl_kernel(%arg0: i32, %arg1: i32, %arg2: memref<8x32xf32, #tpu.memory_space<vmem>>, %arg3: memref<128x32xf32, #tpu.memory_space<vmem>>, %arg4: memref<8x1xi32, #tpu.memory_space<vmem>>, %arg5: memref<8x128xf32, #tpu.memory_space<vmem>>, %arg6: memref<8x128xf32, #tpu.memory_space<vmem>>, %arg7: memref<128x32xf32, #tpu.memory_space<vmem>>) attributes {dimension_semantics = [#tpu.dimension_semantics<parallel>, #tpu.dimension_semantics<arbitrary>], iteration_bounds = array<i64: 1, 1>, scalar_prefetch = 0 : i64, scratch_operands = 1 : i64, tpu.core_type = #tpu.core_type<tc>, window_params = [{transform_indices = @transform_0, window_bounds = array<i64: 8, 32>}, {transform_indices = @transform_1, window_bounds = array<i64: 128, 32>}, {transform_indices = @transform_2, window_bounds = array<i64: 8, 1>}, {transform_indices = @transform_3, window_bounds = array<i64: 8, 128>}, {transform_indices = @transform_4, window_bounds = array<i64: 8, 128>}]} {
    %c0_i32 = arith.constant 0 : i32
    %0 = arith.cmpi eq, %arg1, %c0_i32 : i32
    %1 = arith.extui %0 : i1 to i32
    %c0_i32_0 = arith.constant 0 : i32
    %2 = arith.cmpi ne, %1, %c0_i32_0 : i32
    scf.if %2 {
      %c0_15 = arith.constant 0 : index
      %c0_16 = arith.constant 0 : index
      %29 = vector.load %arg3[%c0_15, %c0_16] : memref<128x32xf32, #tpu.memory_space<vmem>>, vector<128x32xf32>
      %30 = arith.mulf %29, %29 : vector<128x32xf32>
      %cst_17 = arith.constant dense<0.000000e+00> : vector<128xf32>
      %31 = vector.multi_reduction <add>, %30, %cst_17 [1] : vector<128x32xf32> to vector<128xf32>
      %32 = vector.shape_cast %31 : vector<128xf32> to vector<128x1xf32>
      %cst_18 = arith.constant 9.99999996E-13 : f32
      %33 = vector.broadcast %cst_18 : f32 to vector<128x1xf32>
      %34 = arith.maximumf %32, %33 : vector<128x1xf32>
      %35 = math.rsqrt %34 : vector<128x1xf32>
      %36 = vector.broadcast %35 : vector<128x1xf32> to vector<128x32xf32>
      %37 = arith.mulf %29, %36 : vector<128x32xf32>
      %c0_19 = arith.constant 0 : index
      %c0_20 = arith.constant 0 : index
      %38 = vector.load %arg7[%c0_19, %c0_20] : memref<128x32xf32, #tpu.memory_space<vmem>>, vector<128x32xf32>
      tpu.vector_store %arg7[%c0_19, %c0_20], %37 {strides = array<i32>} : memref<128x32xf32, #tpu.memory_space<vmem>>, vector<128x32xf32>,
    } else {
    }
    %c0 = arith.constant 0 : index
    %c0_1 = arith.constant 0 : index
    %3 = vector.load %arg2[%c0, %c0_1] : memref<8x32xf32, #tpu.memory_space<vmem>>, vector<8x32xf32>
    %4 = arith.mulf %3, %3 : vector<8x32xf32>
    %cst = arith.constant dense<0.000000e+00> : vector<8xf32>
    %5 = vector.multi_reduction <add>, %4, %cst [1] : vector<8x32xf32> to vector<8xf32>
    %6 = vector.shape_cast %5 : vector<8xf32> to vector<8x1xf32>
    %cst_2 = arith.constant 9.99999996E-13 : f32
    %7 = vector.broadcast %cst_2 : f32 to vector<8x1xf32>
    %8 = arith.maximumf %6, %7 : vector<8x1xf32>
    %9 = math.rsqrt %8 : vector<8x1xf32>
    %10 = vector.broadcast %9 : vector<8x1xf32> to vector<8x32xf32>
    %11 = arith.mulf %3, %10 : vector<8x32xf32>
    %c0_3 = arith.constant 0 : index
    %c0_4 = arith.constant 0 : index
    %12 = vector.load %arg7[%c0_3, %c0_4] : memref<128x32xf32, #tpu.memory_space<vmem>>, vector<128x32xf32>
    %cst_5 = arith.constant dense<0.000000e+00> : vector<8x128xf32>
    %13 = tpu.matmul %11, %12, %cst_5 {dimension_numbers = #tpu.dot_dimension_numbers<[1], [1], [0], [0], [0, 0, 1, 0], [], []>} : vector<8x32xf32>, vector<128x32xf32>, vector<8x128xf32> -> vector<8x128xf32>
    %c0_6 = arith.constant 0 : index
    %c0_7 = arith.constant 0 : index
    %14 = vector.load %arg5[%c0_6, %c0_7] : memref<8x128xf32, #tpu.memory_space<vmem>>, vector<8x128xf32>
    tpu.vector_store %arg5[%c0_6, %c0_7], %13 {strides = array<i32>} : memref<8x128xf32, #tpu.memory_space<vmem>>, vector<8x128xf32>,
    %c0_8 = arith.constant 0 : index
    %c0_9 = arith.constant 0 : index
    %15 = vector.load %arg4[%c0_8, %c0_9] : memref<8x1xi32, #tpu.memory_space<vmem>>, vector<8x1xi32>
    %c128_i32 = arith.constant 128 : i32
    %16 = arith.muli %arg0, %c128_i32 : i32
    %17 = tpu.iota {dimensions = array<i32: 1>} : vector<8x128xi32>
    %18 = vector.broadcast %16 : i32 to vector<8x128xi32>
    %19 = arith.addi %18, %17 : vector<8x128xi32>
    %cst_10 = arith.constant 7.000000e+00 : f32
    %20 = vector.broadcast %cst_10 : f32 to vector<8x128xf32>
    %21 = arith.mulf %20, %13 : vector<8x128xf32>
    %22 = vector.broadcast %15 : vector<8x1xi32> to vector<8x128xi32>
    %23 = arith.cmpi eq, %19, %22 : vector<8x128xi32>
    %cst_11 = arith.constant 1.400000e+00 : f32
    %cst_12 = arith.constant 0.000000e+00 : f32
    %24 = vector.broadcast %cst_11 : f32 to vector<8x128xf32>
    %25 = vector.broadcast %cst_12 : f32 to vector<8x128xf32>
    %26 = arith.select %23, %24, %25 : vector<8x128xi1>, vector<8x128xf32>
    %27 = arith.subf %21, %26 : vector<8x128xf32>
    %c0_13 = arith.constant 0 : index
    %c0_14 = arith.constant 0 : index
    %28 = vector.load %arg6[%c0_13, %c0_14] : memref<8x128xf32, #tpu.memory_space<vmem>>, vector<8x128xf32>
    tpu.vector_store %arg6[%c0_13, %c0_14], %27 {strides = array<i32>} : memref<8x128xf32, #tpu.memory_space<vmem>>, vector<8x128xf32>,
    return
  }
  func.func @transform_0(%arg0: i32, %arg1: i32) -> (i32, i32) {
    %c0_i32 = arith.constant 0 : i32
    %c0_i32_0 = arith.constant 0 : i32
    return %arg1, %c0_i32 : i32, i32
  }
  func.func @transform_1(%arg0: i32, %arg1: i32) -> (i32, i32) {
    %c0_i32 = arith.constant 0 : i32
    %c0_i32_0 = arith.constant 0 : i32
    return %arg0, %c0_i32 : i32, i32
  }
  func.func @transform_2(%arg0: i32, %arg1: i32) -> (i32, i32) {
    %c0_i32 = arith.constant 0 : i32
    %c0_i32_0 = arith.constant 0 : i32
    return %arg1, %c0_i32 : i32, i32
  }
  func.func @transform_3(%arg0: i32, %arg1: i32) -> (i32, i32) {
    %c0_i32 = arith.constant 0 : i32
    return %arg1, %arg0 : i32, i32
  }
  func.func @transform_4(%arg0: i32, %arg1: i32) -> (i32, i32) {
    %c0_i32 = arith.constant 0 : i32
    return %arg1, %arg0 : i32, i32
  }
}

</mosaic_0001>

<bundles_post_ra>
// kernel: tpu_custom_call.1
= control target key start
LH: loop header
LB: loop body
LE: loop exit
PB: predicated region body
PF: predicated region fallthrough
CT: control target
= control target key end

     0   :  { %10 = vsyncpa [#allocation4], 0  ;;  %vm54_vm0 = vcmask 261120   ;;  %s1004_s0 = inlined_call_operand.vmem [shape: f32[8,32], index: 0, kind: input, shape index: {}]   ;;  %s1005_s1 = inlined_call_operand.vmem [shape: f32[128,32], index: 1, kind: input, shape index: {}]   ;;  %s1006_s2 = inlined_call_operand.vmem [shape: s32[8,1], index: 2, kind: input, shape index: {}]   ;;  %s1007_s3 = inlined_call_operand.hbm [shape: f32[8,128], index: 3, kind: output, shape index: {0}]   ;;  %s1008_s4 = inlined_call_operand.hbm [shape: f32[8,128], index: 4, kind: output, shape index: {1}]  }
   0x1   :  { %v604_v0 = vld [vmem:[%s1005_s1 + $0x78] sm:$0xff]  ;;  %v609_v1 = vld [vmem:[%s1005_s1 + $0x68] sm:$0xff]  ;;  %v625_v6 = vld [vmem:[%s1005_s1 + $0x70] sm:$0xff] }
   0x2   :  { %v614_v2 = vld [vmem:[%s1005_s1 + $0x58] sm:$0xff]  ;;  %v53_v3 = vmul.f32 %v604_v0, %v604_v0  ;;  %v51_v4 = vmul.f32 %v609_v1, %v609_v1  ;;  %v630_v7 = vld [vmem:[%s1005_s1 + $0x60] sm:$0xff]  ;;  %v638_v11 = vld [vmem:[%s1005_s1 + $0x50] sm:$0xff]  ;;  %v52_v12 = vmul.f32 %v625_v6, %v625_v6 }
   0x3   :  { %v49_v5 = vmul.f32 %v614_v2, %v614_v2  ;;  %v50_v13 = vmul.f32 %v630_v7, %v630_v7 }
   0x4   :  { %v100_v8 = vsel %vm54_vm0, %v53_v3, 0.0  ;;  %v94_v9 = vsel %vm54_vm0, %v51_v4, 0.0 }
   0x5   :  { %v88_v10 = vsel %vm54_vm0, %v49_v5, 0.0  ;;  %101 = vadd.xlane.f32.xlu0 %v100_v8  ;;  %95 = vadd.xlane.f32.xlu1 %v94_v9 }
   0x6   :  { %89 = vadd.xlane.f32.xlu2 %v88_v10 }
   0x7   :  { %11 = vsyncpa [#allocation6], 0  ;;  %v48_v14 = vmul.f32 %v638_v11, %v638_v11  ;;  %v97_v15 = vsel %vm54_vm0, %v52_v12, 0.0  ;;  %v91_v16 = vsel %vm54_vm0, %v50_v13, 0.0  ;;  %v652_v18 = vld [vmem:[%s1005_s1 + $0x48] sm:$0xff]  ;;  %v657_v19 = vld [vmem:[%s1005_s1 + $0x40] sm:$0xff] }
   0x8   :  { %v662_v20 = vld [vmem:[%s1005_s1 + $0x38] sm:$0xff]  ;;  %v47_v21 = vmul.f32 %v652_v18, %v652_v18  ;;  %v46_v22 = vmul.f32 %v657_v19, %v657_v19  ;;  %v676_v27 = vld [vmem:[%s1005_s1 + $0x30] sm:$0xff]  ;;  %v681_v28 = vld [vmem:[%s1005_s1 + $0x28] sm:$0xff]  ;;  %s438_s26 = sshll.u32 %s1007_s3, 4  ;;  %s575_s27 = smov [#allocation5]   ;;  %s439_s26 = int_to_ptr.hbm [resolvable:$true] %s438_s26 }
   0x9   :  { %v85_v17 = vsel %vm54_vm0, %v48_v14, 0.0  ;;  %v45_v23 = vmul.f32 %v662_v20, %v662_v20  ;;  %v686_v29 = vld [vmem:[%s1005_s1 + $0x20] sm:$0xff]  ;;  %v44_v30 = vmul.f32 %v676_v27, %v676_v27  ;;  %v43_v31 = vmul.f32 %v681_v28, %v681_v28  ;;  %v700_v36 = vld [vmem:[%s1005_s1 + $0x18] sm:$0xff]  ;;  %v705_v37 = vld [vmem:[%s1005_s1 + $0x10] sm:$0xff]  ;;  %s447_s28 = sshll.u32 %s575_s27, 4  ;;  %s449_s5 = sshll.u32 %s1008_s4, 4  ;;  %s448_s28 = int_to_ptr.vmem [resolvable:$true] %s447_s28  ;;  %s450_s5 = int_to_ptr.hbm [resolvable:$true] %s449_s5 }
   0xa   :  { %v82_v24 = vsel %vm54_vm0, %v47_v21, 0.0  ;;  %v79_v25 = vsel %vm54_vm0, %v46_v22, 0.0  ;;  %v42_v32 = vmul.f32 %v686_v29, %v686_v29  ;;  %v710_v38 = vld [vmem:[%s1005_s1 + $0x8] sm:$0xff]  ;;  %v41_v39 = vmul.f32 %v700_v36, %v700_v36  ;;  %v724_v45 = vld [vmem:[%s1005_s1] sm:$0xff] }
   0xb   :  { %v76_v26 = vsel %vm54_vm0, %v45_v23, 0.0  ;;  %v73_v33 = vsel %vm54_vm0, %v44_v30, 0.0  ;;  %v70_v34 = vsel %vm54_vm0, %v43_v31, 0.0  ;;  %v40_v40 = vmul.f32 %v705_v37, %v705_v37  ;;  %v729_v46 = vld [vmem:[%s1004_s0] sm:$0xff] }
   0xc   :  { %v67_v35 = vsel %vm54_vm0, %v42_v32, 0.0  ;;  %v39_v41 = vmul.f32 %v710_v38, %v710_v38  ;;  %v64_v42 = vsel %vm54_vm0, %v41_v39, 0.0  ;;  %v38_v47 = vmul.f32 %v724_v45, %v724_v45 }
   0xd   :  { %98 = vadd.xlane.f32.xlu0 %v97_v15  ;;  %92 = vadd.xlane.f32.xlu1 %v91_v16  ;;  %v61_v43 = vsel %vm54_vm0, %v40_v40, 0.0  ;;  %v312_v48 = vmul.f32 %v729_v46, %v729_v46 }
   0xe   :  { %86 = vadd.xlane.f32.xlu2 %v85_v17  ;;  %v58_v44 = vsel %vm54_vm0, %v39_v41, 0.0  ;;  %v55_v49 = vsel %vm54_vm0, %v38_v47, 0.0 }
   0xf   :  { %v314_v50 = vsel %vm54_vm0, %v312_v48, 0.0 }
  0x15   :  { %83 = vadd.xlane.f32.xlu0 %v82_v24  ;;  %80 = vadd.xlane.f32.xlu1 %v79_v25 }
  0x16   :  { %77 = vadd.xlane.f32.xlu2 %v76_v26 }
  0x1d   :  { %74 = vadd.xlane.f32.xlu0 %v73_v33  ;;  %71 = vadd.xlane.f32.xlu1 %v70_v34 }
  0x1e   :  { %68 = vadd.xlane.f32.xlu2 %v67_v35 }
  0x25   :  { %65 = vadd.xlane.f32.xlu0 %v64_v42  ;;  %62 = vadd.xlane.f32.xlu1 %v61_v43 }
  0x26   :  { %59 = vadd.xlane.f32.xlu2 %v58_v44 }
  0x2d   :  { %56 = vadd.xlane.f32.xlu0 %v55_v49  ;;  %315 = vadd.xlane.f32.xlu1 %v314_v50 }
  0x78   :  { %v102_v51 = vpop.xlane.xlu0 %101  ;;  %v96_v52 = vpop.xlane.xlu1 %95 }
  0x79   :  { %v118_v53 = vmax.f32 %v102_v51, 1e-12  ;;  %v116_v54 = vmax.f32 %v96_v52, 1e-12  ;;  %v90_v55 = vpop.xlane.xlu2 %89 }
  0x7a   :  { %v114_v56 = vmax.f32 %v90_v55, 1e-12 }
  0x7b   :  { %486 = vrsqrt.f32 %v118_v53  ;;  %vm275_vm1 = vweird.f32 %v118_v53  ;;  %vm255_vm3 = vweird.f32 %v116_v54 }
  0x7c   :  { %488 = vrsqrt.f32 %v116_v54  ;;  %vm235_vm4 = vweird.f32 %v114_v56 }
  0x7d   :  { %490 = vrsqrt.f32 %v114_v56 }
  0x80   :  { %v99_v57 = vpop.xlane.xlu0 %98  ;;  %v93_v58 = vpop.xlane.xlu1 %92 }
  0x81   :  { %v487_v59 = vpop.eup %486  ;;  %v737_v60 = vmax.f32 %v99_v57, 1e-12  ;;  %v739_v61 = vmax.f32 %v93_v58, 1e-12  ;;  %v87_v62 = vpop.xlane.xlu2 %86 }
  0x82   :  { %v489_v63 = vpop.eup %488  ;;  %v270_v3 = vmul.f32 %v487_v59, %v118_v53  ;;  %v741_v4 = vmax.f32 %v87_v62, 1e-12  ;;  %vm276_vm2 = vweird.f32 %v487_v59 }
  0x83   :  { %v491_v5 = vpop.eup %490  ;;  %v250_v8 = vmul.f32 %v489_v63, %v116_v54  ;;  %492 = vrsqrt.f32 %v737_v60  ;;  %vm256_vm6 = vweird.f32 %v489_v63  ;;  %vm265_vm7 = vweird.f32 %v737_v60  ;;  %vm753_vm8 = vmor %vm275_vm1, %vm276_vm2 }
  0x84   :  { %v271_v9 = vmul.f32 %v487_v59, %v270_v3  ;;  %v230_v10 = vmul.f32 %v491_v5, %v114_v56  ;;  %494 = vrsqrt.f32 %v739_v61  ;;  %vm236_vm5 = vweird.f32 %v491_v5  ;;  %vm257_vm11 = vmor %vm255_vm3, %vm256_vm6 }
  0x85   :  { %v251_v12 = vmul.f32 %v489_v63, %v250_v8  ;;  %496 = vrsqrt.f32 %v741_v4  ;;  %vm245_vm9 = vweird.f32 %v739_v61  ;;  %vm762_vm10 = vmor %vm235_vm4, %vm236_vm5  ;;  %vm225_vm12 = vweird.f32 %v741_v4 }
  0x86   :  { %v272_v13 = vmul.f32 0.5, %v271_v9  ;;  %v231_v14 = vmul.f32 %v491_v5, %v230_v10 }
  0x87   :  { %v252_v15 = vmul.f32 0.5, %v251_v12 }
  0x88   :  { %v273_v16 = vsub.f32 1.5, %v272_v13  ;;  %v232_v17 = vmul.f32 0.5, %v231_v14  ;;  %v84_v21 = vpop.xlane.xlu0 %83  ;;  %v81_v22 = vpop.xlane.xlu1 %80 }
  0x89   :  { %v746_v23 = vpop.eup %492  ;;  %v253_v24 = vsub.f32 1.5, %v252_v15  ;;  %v749_v25 = vmax.f32 %v84_v21, 1e-12  ;;  %v768_v41 = vmax.f32 %v81_v22, 1e-12  ;;  %v78_v48 = vpop.xlane.xlu2 %77 }
  0x8a   :  { %v495_v26 = vpop.eup %494  ;;  %v274_v30 = vmul.f32 %v487_v59, %v273_v16  ;;  %v233_v32 = vsub.f32 1.5, %v232_v17  ;;  %v260_v33 = vmul.f32 %v746_v23, %v737_v60  ;;  %vm266_vm13 = vweird.f32 %v746_v23 }
  0x8b   :  { %v497_v34 = vpop.eup %496  ;;  %v254_v35 = vmul.f32 %v489_v63, %v253_v24  ;;  %v240_v40 = vmul.f32 %v495_v26, %v739_v61  ;;  %498 = vrsqrt.f32 %v749_v25  ;;  %vm246_vm15 = vweird.f32 %v495_v26  ;;  %vm267_vm1 = vmor %vm265_vm7, %vm266_vm13 }
  0x8c   :  { %v278_v42 = vsel %vm753_vm8, %v487_v59, %v274_v30  ;;  %v234_v43 = vmul.f32 %v491_v5, %v233_v32  ;;  %v261_v44 = vmul.f32 %v746_v23, %v260_v33  ;;  %v220_v47 = vmul.f32 %v497_v34, %v741_v4  ;;  %vm247_vm3 = vmor %vm245_vm9, %vm246_vm15 }
  0x8d   :  { %v294_v49 = vmul.f32 %v278_v42, %v604_v0  ;;  %v258_v50 = vsel %vm257_vm11, %v489_v63, %v254_v35  ;;  %v241_v51 = vmul.f32 %v495_v26, %v240_v40  ;;  %500 = vrsqrt.f32 %v768_v41 }
  0x8e   :  { %v292_v52 = vmul.f32 %v258_v50, %v609_v1  ;;  %v238_v53 = vsel %vm762_vm10, %v491_v5, %v234_v43  ;;  %v262_v55 = vmul.f32 0.5, %v261_v44  ;;  %v221_v54 = vmul.f32 %v497_v34, %v220_v47 }
  0x8f   :  { %310 = vst.msk [vmem:[#allocation2 + $0x78] sm:$0xff] %vm54_vm0, %v294_v49  ;;  %v290_v56 = vmul.f32 %v238_v53, %v614_v2  ;;  %v242_v57 = vmul.f32 0.5, %v241_v51  ;;  %vm226_vm14 = vweird.f32 %v497_v34  ;;  %v786_v1 = vmax.f32 %v78_v48, 1e-12 }
  0x90   :  { %308 = vst.msk [vmem:[#allocation2 + $0x68] sm:$0xff] %vm54_vm0, %v292_v52  ;;  %v263_v0 = vsub.f32 1.5, %v262_v55  ;;  %v222_v58 = vmul.f32 0.5, %v221_v54  ;;  %v75_v59 = vpop.xlane.xlu0 %74  ;;  %v72_v62 = vpop.xlane.xlu1 %71  ;;  %vm802_vm2 = vmor %vm225_vm12, %vm226_vm14  ;;  %vm215_vm4 = vweird.f32 %v749_v25  ;;  %vm205_vm6 = vweird.f32 %v768_v41 }
  0x91   :  { %v499_v63 = vpop.eup %498  ;;  %306 = vst.msk [vmem:[#allocation2 + $0x58] sm:$0xff] %vm54_vm0, %v290_v56  ;;  %v243_v3 = vsub.f32 1.5, %v242_v57  ;;  %v789_v2 = vmax.f32 %v75_v59, 1e-12  ;;  %v791_v5 = vmax.f32 %v72_v62, 1e-12  ;;  %502 = vrsqrt.f32 %v786_v1  ;;  %v69_v16 = vpop.xlane.xlu2 %68 }
  0x92   :  { %v264_v8 = vmul.f32 %v746_v23, %v263_v0  ;;  %v223_v9 = vsub.f32 1.5, %v222_v58  ;;  %v210_v10 = vmul.f32 %v499_v63, %v749_v25  ;;  %vm216_vm5 = vweird.f32 %v499_v63 }
  0x93   :  { %v244_v12 = vmul.f32 %v495_v26, %v243_v3  ;;  %504 = vrsqrt.f32 %v789_v2  ;;  %v811_v17 = vpop.eup %500  ;;  %vm217_vm8 = vmor %vm215_vm4, %vm216_vm5  ;;  %vm195_vm9 = vweird.f32 %v786_v1  ;;  %vm185_vm10 = vweird.f32 %v789_v2 }
  0x94   :  { %v268_v14 = vsel %vm267_vm1, %v746_v23, %v264_v8  ;;  %v224_v60 = vmul.f32 %v497_v34, %v223_v9  ;;  %v211_v15 = vmul.f32 %v499_v63, %v210_v10  ;;  %506 = vrsqrt.f32 %v791_v5 }
  0x95   :  { %v293_v4 = vmul.f32 %v268_v14, %v625_v6  ;;  %v248_v21 = vsel %vm247_vm3, %v495_v26, %v244_v12  ;;  %v200_v61 = vmul.f32 %v811_v17, %v768_v41  ;;  %v823_v6 = vmax.f32 %v69_v16, 1e-12 }
  0x96   :  { %v291_v22 = vmul.f32 %v248_v21, %v630_v7  ;;  %v228_v23 = vsel %vm802_vm2, %v497_v34, %v224_v60  ;;  %v212_v24 = vmul.f32 0.5, %v211_v15  ;;  %v344_v30 = vld [vmem:[#allocation2 + $0x78] sm:$0xff]  ;;  %vm206_vm7 = vweird.f32 %v811_v17 }
  0x97   :  { %309 = vst.msk [vmem:[#allocation2 + $0x70] sm:$0xff] %vm54_vm0, %v293_v4  ;;  %v289_v31 = vmul.f32 %v228_v23, %v638_v11  ;;  %463 = vmatpush.xpose.msk.msra.mxu0 %vm54_vm0, %v344_v30  ;;  %v201_v7 = vmul.f32 %v811_v17, %v200_v61  ;;  %v828_v34 = vpop.eup %502  ;;  %508 = vrsqrt.f32 %v823_v6  ;;  %vm858_vm11 = vmor %vm205_vm6, %vm206_vm7  ;;  %vm175_vm12 = vweird.f32 %v791_v5  ;;  %v342_v16 = vld [vmem:[#allocation2 + $0x68] sm:$0xff] }
  0x98   :  { %307 = vst.msk [vmem:[#allocation2 + $0x60] sm:$0xff] %vm54_vm0, %v291_v22  ;;  %v213_v26 = vsub.f32 1.5, %v212_v24  ;;  %v66_v32 = vpop.xlane.xlu0 %65  ;;  %v63_v33 = vpop.xlane.xlu1 %62  ;;  %v190_v43 = vmul.f32 %v828_v34, %v786_v1  ;;  %vm196_vm13 = vweird.f32 %v828_v34  ;;  %vm165_vm2 = vweird.f32 %v823_v6 }
  0x99   :  { %305 = vst.msk [vmem:[#allocation2 + $0x50] sm:$0xff] %vm54_vm0, %v289_v31  ;;  %v833_v11 = vmax.f32 %v66_v32, 1e-12  ;;  %v835_v35 = vmax.f32 %v63_v33, 1e-12  ;;  %v837_v39 = vpop.eup %504  ;;  %v202_v42 = vmul.f32 0.5, %v201_v7  ;;  %v60_v52 = vpop.xlane.xlu2 %59  ;;  %vm888_vm1 = vmor %vm195_vm9, %vm196_vm13 }
  0x9a   :  { %v214_v40 = vmul.f32 %v499_v63, %v213_v26  ;;  %v842_v44 = vpop.eup %506  ;;  %v180_v47 = vmul.f32 %v837_v39, %v789_v2  ;;  %v191_v50 = vmul.f32 %v828_v34, %v190_v43  ;;  %vm186_vm14 = vweird.f32 %v837_v39 }
  0x9b   :  { %510 = vrsqrt.f32 %v833_v11  ;;  %v203_v49 = vsub.f32 1.5, %v202_v42  ;;  %v170_v51 = vmul.f32 %v842_v44, %v791_v5  ;;  %vm176_vm15 = vweird.f32 %v842_v44  ;;  %vm899_vm3 = vmor %vm185_vm10, %vm186_vm14 }
  0x9c   :  { %v218_v48 = vsel %vm217_vm8, %v499_v63, %v214_v40  ;;  %v181_v55 = vmul.f32 %v837_v39, %v180_v47  ;;  %512 = vrsqrt.f32 %v835_v35  ;;  %v192_v56 = vmul.f32 0.5, %v191_v50  ;;  %vm912_vm4 = vmor %vm175_vm12, %vm176_vm15  ;;  %v340_v50 = vld [vmem:[#allocation2 + $0x58] sm:$0xff] }
  0x9d   :  { %v288_v25 = vmul.f32 %v218_v48, %v652_v18  ;;  %v204_v54 = vmul.f32 %v811_v17, %v203_v49  ;;  %v171_v57 = vmul.f32 %v842_v44, %v170_v51  ;;  %v868_v0 = vpop.eup %508  ;;  %v874_v58 = vmax.f32 %v60_v52, 1e-12 }
  0x9e   :  { %v343_v18 = vld [vmem:[#allocation2 + $0x70] sm:$0xff]  ;;  %v182_v41 = vmul.f32 0.5, %v181_v55  ;;  %v193_v62 = vsub.f32 1.5, %v192_v56  ;;  %v160_v3 = vmul.f32 %v868_v0, %v823_v6  ;;  %vm166_vm5 = vweird.f32 %v868_v0 }
  0x9f   :  { %304 = vst.msk [vmem:[#allocation2 + $0x48] sm:$0xff] %vm54_vm0, %v288_v25  ;;  %464 = vmatpush.xpose.msk.msra.mxu0 %vm54_vm0, %v343_v18  ;;  %v208_v59 = vsel %vm858_vm11, %v811_v17, %v204_v54  ;;  %v172_v63 = vmul.f32 0.5, %v171_v57  ;;  %514 = vrsqrt.f32 %v874_v58  ;;  %vm155_vm6 = vweird.f32 %v833_v11  ;;  %vm942_vm8 = vmor %vm165_vm2, %vm166_vm5 }
  0xa0   :  { %v57_v8 = vpop.xlane.xlu0 %56  ;;  %v287_v10 = vmul.f32 %v208_v59, %v657_v19  ;;  %v183_v13 = vsub.f32 1.5, %v182_v41  ;;  %v194_v14 = vmul.f32 %v828_v34, %v193_v62  ;;  %v161_v60 = vmul.f32 %v868_v0, %v160_v3  ;;  %v339_v56 = vld [vmem:[#allocation2 + $0x50] sm:$0xff] }
  0xa1   :  { %v881_v9 = vpop.eup %510  ;;  %v173_v1 = vsub.f32 1.5, %v172_v63  ;;  %v919_v21 = vmax.f32 %v57_v8, 1e-12  ;;  %vm145_vm10 = vweird.f32 %v835_v35  ;;  %vm135_vm13 = vweird.f32 %v874_v58 }
  0xa2   :  { %v150_v15 = vmul.f32 %v881_v9, %v833_v11  ;;  %v513_v17 = vpop.eup %512  ;;  %303 = vst.msk [vmem:[#allocation2 + $0x40] sm:$0xff] %vm54_vm0, %v287_v10  ;;  %v184_v4 = vmul.f32 %v837_v39, %v183_v13  ;;  %v198_v22 = vsel %vm888_vm1, %v828_v34, %v194_v14  ;;  %v162_v24 = vmul.f32 0.5, %v161_v60  ;;  %v341_v34 = vld [vmem:[#allocation2 + $0x60] sm:$0xff] }
  0xa3   :  { %465 = vmatpush.xpose.msk.msra.mxu0 %vm54_vm0, %v342_v16  ;;  %v174_v23 = vmul.f32 %v842_v44, %v173_v1  ;;  %v286_v61 = vmul.f32 %v198_v22, %v662_v20  ;;  %vm156_vm7 = vweird.f32 %v881_v9  ;;  %v140_v31 = vmul.f32 %v513_v17, %v835_v35 }
  0xa4   :  { %v151_v5 = vmul.f32 %v881_v9, %v150_v15  ;;  %v188_v30 = vsel %vm899_vm3, %v837_v39, %v184_v4  ;;  %v163_v32 = vsub.f32 1.5, %v162_v24  ;;  %516 = vrsqrt.f32 %v919_v21  ;;  %vm956_vm9 = vmor %vm155_vm6, %vm156_vm7 }
  0xa5   :  { %v285_v26 = vmul.f32 %v188_v30, %v676_v27  ;;  %v178_v7 = vsel %vm912_vm4, %v842_v44, %v174_v23  ;;  %v515_v40 = vpop.eup %514  ;;  %302 = vst.msk [vmem:[#allocation2 + $0x38] sm:$0xff] %vm54_vm0, %v286_v61  ;;  %v141_v27 = vmul.f32 %v513_v17, %v140_v31  ;;  %vm146_vm11 = vweird.f32 %v513_v17 }
  0xa6   :  { %v152_v33 = vmul.f32 0.5, %v151_v5  ;;  %v284_v20 = vmul.f32 %v178_v7, %v681_v28  ;;  %v164_v42 = vmul.f32 %v868_v0, %v163_v32  ;;  %v130_v28 = vmul.f32 %v515_v40, %v874_v58  ;;  %vm147_vm12 = vmor %vm145_vm10, %vm146_vm11  ;;  %v316_v58 = vpop.xlane.xlu1 %315  ;;  %v338_v62 = vld [vmem:[#allocation2 + $0x48] sm:$0xff] }
  0xa7   :  { %466 = vmatpush.xpose.msk.msra.mxu0 %vm54_vm0, %v341_v34  ;;  %301 = vst.msk [vmem:[#allocation2 + $0x30] sm:$0xff] %vm54_vm0, %v285_v26  ;;  %v142_v44 = vmul.f32 0.5, %v141_v27  ;;  %vm136_vm14 = vweird.f32 %v515_v40  ;;  %vm125_vm1 = vweird.f32 %v919_v21  ;;  %v317_v8 = vmax.f32 %v316_v58, 1e-12 }
  0xa8   :  { %v153_v43 = vsub.f32 1.5, %v152_v33  ;;  %300 = vst.msk [vmem:[#allocation2 + $0x28] sm:$0xff] %vm54_vm0, %v284_v20  ;;  %v168_v47 = vsel %vm942_vm8, %v868_v0, %v164_v42  ;;  %v131_v49 = vmul.f32 %v515_v40, %v130_v28  ;;  %vm137_vm15 = vmor %vm135_vm13, %vm136_vm14  ;;  %v572_v14 = vmov 0  }
  0xa9   :  { %v283_v51 = vmul.f32 %v168_v47, %v686_v29  ;;  %v143_v52 = vsub.f32 1.5, %v142_v44  ;;  %518 = vrsqrt.f32 %v317_v8  ;;  %484 = vset.pattern.permute.xlu2 %v572_v14  ;;  %485 = vset.pattern.permute.xlu0 %v572_v14  ;;  %vm324_vm4 = vweird.f32 %v317_v8 }
  0xaa   :  { %v154_v48 = vmul.f32 %v881_v9, %v153_v43  ;;  %v132_v35 = vmul.f32 0.5, %v131_v49  ;;  %v517_v25 = vpop.eup %516  ;;  %v419_v30 = vlaneseq  ;;  %v574_v7 = vmov 0.0  }
  0xab   :  { %467 = vmatpush.xpose.msk.msra.mxu0 %vm54_vm0, %v340_v50  ;;  %299 = vst.msk [vmem:[#allocation2 + $0x20] sm:$0xff] %vm54_vm0, %v283_v51  ;;  %v144_v55 = vmul.f32 %v513_v17, %v143_v52  ;;  %v120_v29 = vmul.f32 %v517_v25, %v919_v21  ;;  %vm126_vm2 = vweird.f32 %v517_v25 }
  0xac   :  { %v158_v11 = vsel %vm956_vm9, %v881_v9, %v154_v48  ;;  %v133_v54 = vsub.f32 1.5, %v132_v35  ;;  %vm127_vm3 = vmor %vm125_vm1, %vm126_vm2  ;;  %v337_v9 = vld [vmem:[#allocation2 + $0x40] sm:$0xff]  ;;  %v336_v13 = vld [vmem:[#allocation2 + $0x38] sm:$0xff]  ;;  %v420_v31 = vand.u32 127, %v419_v30 }
  0xad   :  { %v282_v53 = vmul.f32 %v158_v11, %v700_v36  ;;  %v148_v57 = vsel %vm147_vm12, %v513_v17, %v144_v55  ;;  %v121_v41 = vmul.f32 %v517_v25, %v120_v29 }
  0xae   :  { %v281_v18 = vmul.f32 %v148_v57, %v705_v37  ;;  %v134_v0 = vmul.f32 %v515_v40, %v133_v54  ;;  %v335_v1 = vld [vmem:[#allocation2 + $0x30] sm:$0xff] }
  0xaf   :  { %298 = vst.msk [vmem:[#allocation2 + $0x18] sm:$0xff] %vm54_vm0, %v282_v53  ;;  %468 = vmatpush.xpose.msk.msra.mxu0 %vm54_vm0, %v339_v56  ;;  %v122_v36 = vmul.f32 0.5, %v121_v41  ;;  %v519_v19 = vpop.eup %518  ;;  %v334_v15 = vld [vmem:[#allocation2 + $0x28] sm:$0xff] }
  0xb0   :  { %297 = vst.msk [vmem:[#allocation2 + $0x10] sm:$0xff] %vm54_vm0, %v281_v18  ;;  %v138_v59 = vsel %vm137_vm15, %v515_v40, %v134_v0  ;;  %v319_v60 = vmul.f32 %v519_v19, %v317_v8  ;;  %vm325_vm5 = vweird.f32 %v519_v19 }
  0xb1   :  { %v280_v63 = vmul.f32 %v138_v59, %v710_v38  ;;  %v123_v3 = vsub.f32 1.5, %v122_v36  ;;  %v417_v38 = vld [vmem:[%s1006_s2] sm:$0xff]  ;;  %vm326_vm6 = vmor %vm324_vm4, %vm325_vm5  ;;  %s573_s2 = smov [#allocation3]  }
  0xb2   :  { %425 = vperm.xlu2 %484, %v417_v38   ;;  %v333_v16 = vld [vmem:[#allocation2 + $0x20] sm:$0xff]  ;;  %s436_s23 = sshll.u32 %s573_s2, 4  ;;  %s437_s23 = int_to_ptr.vmem [resolvable:$true] %s436_s23 }
  0xb3   :  { %469 = vmatpush.xpose.msk.msra.mxu0 %vm54_vm0, %v338_v62  ;;  %296 = vst.msk [vmem:[#allocation2 + $0x8] sm:$0xff] %vm54_vm0, %v280_v63  ;;  %v124_v37 = vmul.f32 %v517_v25, %v123_v3 }
  0xb5   :  { %v128_v10 = vsel %vm127_vm3, %v517_v25, %v124_v37 }
  0xb6   :  { %v279_v12 = vmul.f32 %v128_v10, %v724_v45  ;;  %v320_v45 = vmul.f32 %v519_v19, %v319_v60  ;;  %v332_v4 = vld [vmem:[#allocation2 + $0x18] sm:$0xff] }
  0xb7   :  { %470 = vmatpush.xpose.msk.msra.mxu0 %vm54_vm0, %v337_v9  ;;  %v331_v21 = vld [vmem:[#allocation2 + $0x10] sm:$0xff] }
  0xb8   :  { %295 = vst.msk [vmem:[#allocation2] sm:$0xff] %vm54_vm0, %v279_v12  ;;  %v321_v17 = vmul.f32 0.5, %v320_v45 }
  0xba   :  { %v322_v2 = vsub.f32 1.5, %v321_v17  ;;  %v330_v23 = vld [vmem:[#allocation2 + $0x8] sm:$0xff] }
  0xbb   :  { %471 = vmatpush.xpose.msk.msra.mxu0 %vm54_vm0, %v336_v13 }
  0xbc   :  { %v323_v22 = vmul.f32 %v519_v19, %v322_v2 }
  0xbe   :  { %v327_v24 = vsel %vm326_vm6, %v519_v19, %v323_v22 }
  0xbf   :  { %472 = vmatpush.xpose.msk.msra.mxu0 %vm54_vm0, %v335_v1  ;;  %v329_v5 = vld [vmem:[#allocation2] sm:$0xff]  ;;  %v328_v61 = vmul.f32 %v327_v24, %v729_v46 }
  0xc3   :  { %473 = vmatpush.xpose.msk.msra.mxu0 %vm54_vm0, %v334_v15 }
  0xc7   :  { %474 = vmatpush.xpose.msk.msra.mxu0 %vm54_vm0, %v333_v16 }
  0xcb   :  { %475 = vmatpush.xpose.msk.msra.mxu0 %vm54_vm0, %v332_v4 }
  0xcf   :  { %476 = vmatpush.xpose.msk.msra.mxu0 %vm54_vm0, %v331_v21 }
  0xd3   :  { %477 = vmatpush.xpose.msk.msra.mxu0 %vm54_vm0, %v330_v23 }
  0xd7   :  { %478 = vmatpush.xpose.msk.msra.mxu0 %vm54_vm0, %v329_v5 }
  0xda   :  { %479 = vmatmul.msk.f32.vlgmr.msra.gmra.mxu0 %vm54_vm0, %v328_v61 }
 0x10c   :  { %v426_v26 = vpop.permute.xlu2 %425 }
 0x10d   :  { %vm427_vm7 = vcmp.eq.s32.totalorder %v420_v31, %v426_v26 }
 0x10e   :  { %v428_v32 = vsel %vm427_vm7, 1.4, %v574_v7 }
 0x157   :  { %v413_v33 = vpop.f32.mrf.mxu0 }
 0x158   :  { %416 = vst [vmem:[#allocation3] sm:$0xff] %v413_v33  ;;  %v423_v46 = vmul.f32 7.0, %v413_v33 }
 0x159   :  { %441 = dma.vmem_to_hbm [thread:$0]  %s437_s23, 128, %s439_s26, [#allocation4]  }
 0x15a   :  { %v429_v34 = vsub.f32 %v423_v46, %v428_v32 }
 0x15c   :  { %430 = vst [vmem:[#allocation5] sm:$0xff] %v429_v34 }
 0x15d   :  { %452 = dma.vmem_to_hbm [thread:$0]  %s448_s28, 128, %s450_s5, [#allocation6]  }
 0x15e   :  { %568 = dma.done.wait [#allocation4], 128  }
 0x15f   :  { %569 = vsyncadd [#allocation4], 4294967168 }
 0x160   :  { %570 = dma.done.wait [#allocation6], 128  }
 0x161   :  { %571 = vsyncadd [#allocation6], 4294967168 }
 0x162   :  { %461 = vsyncpa [#allocation4], 1 }
 0x163   :  { %462 = vsyncpa [#allocation6], 1 }

</bundles_post_ra>
